<compile_context>
chip_gen: v7x
topology: tpu7x:2x2x1
jax: 0.10.0
libtpu: 0.0.40
codegen_flags: <defaults>
</compile_context>

<pallas_src>
import math

import jax
import jax.numpy as jnp
from jax.experimental import pallas as pl
from jax.experimental.pallas import tpu as pltpu


# ---------------------------------------------------------------------------
# Kernels
# ---------------------------------------------------------------------------
def ogc_mlp_kernel(msg_ref, dm_ref, w1_ref, b1_ref, w2_ref, b2_ref, out_ref):
    """out_compute MLP over one block of flattened message rows.

    msg_ref : [BM, 2D]  concat(subset_feature, self_feature) rows
    dm_ref  : [BM, 1]   per-row dist_max scale
    w1_ref  : [2D, H]   linear_1 weight (pre-transposed), resident
    b1_ref  : [1, H]    linear_1 bias, resident
    w2_ref  : [1, H]    linear_2 weight row, resident
    b2_ref  : [1, 1]    linear_2 bias (SMEM scalar)
    out_ref : [1, 1, BM] lane-dense output row for this block
    """
    bm = out_ref.shape[-1]

    # messages = concat_features * dist_max  (faithful op order)
    m = msg_ref[...] * dm_ref[...]                                   # [BM, 2D]

    # linear_1 + ReLU (MXU matmul, f32 accumulation)
    h = jnp.dot(m, w1_ref[...], preferred_element_type=jnp.float32)  # [BM, H]
    h = jnp.maximum(h + b1_ref[...], 0.0)

    # linear_2 (output_dim == 1): contract H against the single weight row and
    # emit a lane-dense [1, BM] row instead of a 1-lane [BM, 1] column.
    y = jnp.dot(w2_ref[...], h.T, preferred_element_type=jnp.float32)  # [1, BM]
    y = y + b2_ref[0, 0]

    out_ref[...] = y.reshape(1, 1, bm)


def normalize_embedding_kernel(x_ref, o_ref):
    """(x - mean(x, dim=0)) / std(x, dim=0) with unbiased std (torch default)."""
    x = x_ref[...]                                                   # [N, K]
    n = x.shape[0]
    mean = jnp.mean(x, axis=0, keepdims=True)                        # [1, K]
    var = jnp.sum((x - mean) ** 2, axis=0, keepdims=True) / (n - 1)  # [1, K]
    o_ref[...] = (x - mean) * jax.lax.rsqrt(var)                     # rsqrt: 1 EUP op


# ---------------------------------------------------------------------------
# Wrapper
# ---------------------------------------------------------------------------
def _pick_block_rows(m, target=512):
    bm = min(target, m)
    while bm > 8 and (m % bm or bm % 8):
        bm -= 8
    return bm if (m % bm == 0 and bm % 8 == 0) else m


def ordered_graph_conv_forward(feature, dist, dist_max, dist_argmax,
                               w1, b1, w2, b2, *, block_rows=512):
    """feature: [N, D], dist_max/dist_argmax: [N, K]; w1: [H, 2D], b1: [H],
    w2: [1, H], b2: [1].  Returns normalized out of shape [N, K]."""
    del dist  # unused on the non-dist_only path (matches the PyTorch forward)
    n, d = feature.shape
    k = dist_max.shape[1]
    h = w1.shape[0]
    two_d = 2 * d
    m = n * k

    # --- message construction (pure indexing) left to XLA -------------------
    sub_flat = jnp.take(feature, dist_argmax.reshape(-1), axis=0)    # [M, D]
    self_flat = jnp.repeat(feature, k, axis=0)                       # [M, D]
    msg_base = jnp.concatenate([sub_flat, self_flat], axis=-1)       # [M, 2D]
    dm_flat = dist_max.reshape(m, 1).astype(jnp.float32)             # [M, 1]

    bm = _pick_block_rows(m, block_rows)
    num_blocks = m // bm

    w1_t = jnp.asarray(w1, jnp.float32).T                            # [2D, H]
    b1_row = jnp.asarray(b1, jnp.float32).reshape(1, h)              # [1, H]
    w2_row = jnp.asarray(w2, jnp.float32).reshape(1, h)              # [1, H]
    b2_s = jnp.asarray(b2, jnp.float32).reshape(1, 1)                # [1, 1]

    out_blocks = pl.pallas_call(
        ogc_mlp_kernel,
        out_shape=jax.ShapeDtypeStruct((num_blocks, 1, bm), jnp.float32),
        grid=(num_blocks,),
        in_specs=[
            pl.BlockSpec((bm, two_d), lambda i: (i, 0)),        # messages: streamed
            pl.BlockSpec((bm, 1), lambda i: (i, 0)),            # dist_max:  streamed
            pl.BlockSpec((two_d, h), lambda i: (0, 0)),         # w1: VMEM-resident
            pl.BlockSpec((1, h), lambda i: (0, 0)),             # b1: VMEM-resident
            pl.BlockSpec((1, h), lambda i: (0, 0)),             # w2: VMEM-resident
            pl.BlockSpec(memory_space=pltpu.MemorySpace.SMEM),  # b2: SMEM scalar
        ],
        out_specs=pl.BlockSpec((1, 1, bm), lambda i: (i, 0, 0)),
        compiler_params=pltpu.CompilerParams(
            dimension_semantics=("parallel",)),
    )(msg_base.astype(jnp.float32), dm_flat, w1_t, b1_row, w2_row, b2_s)

    out_raw = out_blocks.reshape(n, k)

    # normalize_embedding: needs all N rows -> single-block kernel
    out_norm = pl.pallas_call(
        normalize_embedding_kernel,
        out_shape=jax.ShapeDtypeStruct((n, k), jnp.float32),
        in_specs=[pl.BlockSpec(memory_space=pltpu.MemorySpace.VMEM)],
        out_specs=pl.BlockSpec(memory_space=pltpu.MemorySpace.VMEM),
    )(out_raw)
    return out_norm


# ---------------------------------------------------------------------------
# Parameter init (mirrors MLP.__init__: xavier_uniform with relu gain, zero bias)
# ---------------------------------------------------------------------------
def xavier_uniform_relu(key, out_dim, in_dim):
    gain = math.sqrt(2.0)
    bound = gain * math.sqrt(6.0 / (in_dim + out_dim))
    return jax.random.uniform(key, (out_dim, in_dim), jnp.float32,
                              minval=-bound, maxval=bound)


if __name__ == "__main__":
    key = jax.random.PRNGKey(0)
    k_f, k_dm, k_idx, k_w1, k_w2 = jax.random.split(key, 5)

    # Small shapes consistent with the module: N nodes, K anchor sets,
    # input_dim D, hidden_dim H, output_dim (unused: output_hidden=False).
    N, K, D, H = 128, 16, 32, 32

    feature = jax.random.normal(k_f, (N, D), jnp.float32)
    dist_max = jax.random.uniform(k_dm, (N, K), jnp.float32,
                                  minval=0.1, maxval=1.0)
    dist_argmax = jax.random.randint(k_idx, (N, K), 0, N, dtype=jnp.int32)
    dist = jnp.zeros((N, N), jnp.float32)  # unused on the non-dist_only path

    # out_compute MLP params: Linear(2D -> H), Linear(H -> 1)
    w1 = xavier_uniform_relu(k_w1, H, 2 * D)   # torch layout [H, 2D]
    w2 = xavier_uniform_relu(k_w2, 1, H)       # [1, H]
    b1 = jnp.zeros((H,), jnp.float32)
    b2 = jnp.zeros((1,), jnp.float32)

    out = ordered_graph_conv_forward(feature, dist, dist_max, dist_argmax,
                                     w1, b1, w2, b2)
    out = jax.block_until_ready(out)
    assert out.shape == (N, K), out.shape

    # ---- pure-JAX reference mirroring the PyTorch forward ------------------
    sub = feature[dist_argmax.reshape(-1), :].reshape(N, K, D)
    self_f = jnp.broadcast_to(feature[:, None, :], (N, K, D))
    msgs = jnp.concatenate([sub, self_f], axis=-1) * dist_max[..., None]
    hh = jnp.maximum(msgs.reshape(-1, 2 * D) @ w1.T + b1, 0.0)
    y = (hh @ w2.T + b2).reshape(N, K)
    mean = jnp.mean(y, axis=0, keepdims=True)
    std = jnp.sqrt(jnp.sum((y - mean) ** 2, axis=0, keepdims=True) / (N - 1))
    ref = (y - mean) / std

    assert jnp.allclose(out, ref, rtol=3e-2, atol=3e-2), (
        float(jnp.max(jnp.abs(out - ref))))

    print("KERNEL_OK")
</pallas_src>

<mosaic_0001>
module attributes {stable_mosaic.version = 11 : i64} {
  func.func @ogc_mlp_kernel(%arg0: i32, %arg1: memref<512x64xf32, #tpu.memory_space<vmem>>, %arg2: memref<512x1xf32, #tpu.memory_space<vmem>>, %arg3: memref<64x32xf32, #tpu.memory_space<vmem>>, %arg4: memref<1x32xf32, #tpu.memory_space<vmem>>, %arg5: memref<1x32xf32, #tpu.memory_space<vmem>>, %arg6: memref<1x1xf32, #tpu.memory_space<smem>>, %arg7: memref<1x1x512xf32, #tpu.memory_space<vmem>>) attributes {dimension_semantics = [#tpu.dimension_semantics<parallel>], iteration_bounds = array<i64: 4>, scalar_prefetch = 0 : i64, scratch_operands = 0 : i64, tpu.core_type = #tpu.core_type<tc>, window_params = [{transform_indices = @transform_0, window_bounds = array<i64: 512, 64>}, {transform_indices = @transform_1, window_bounds = array<i64: 512, 1>}, {pipeline_mode = #tpu.pipeline_mode<synchronous>, transform_indices = @transform_2, window_bounds = array<i64: 64, 32>}, {pipeline_mode = #tpu.pipeline_mode<synchronous>, transform_indices = @transform_3, window_bounds = array<i64: 1, 32>}, {pipeline_mode = #tpu.pipeline_mode<synchronous>, transform_indices = @transform_4, window_bounds = array<i64: 1, 32>}, {transform_indices = @transform_5, window_bounds = array<i64: 1, 1>}, {transform_indices = @transform_6, window_bounds = array<i64: 1, 1, 512>}]} {
    %c0 = arith.constant 0 : index
    %c0_0 = arith.constant 0 : index
    %0 = vector.load %arg1[%c0, %c0_0] : memref<512x64xf32, #tpu.memory_space<vmem>>, vector<512x64xf32>
    %c0_1 = arith.constant 0 : index
    %c0_2 = arith.constant 0 : index
    %1 = vector.load %arg2[%c0_1, %c0_2] : memref<512x1xf32, #tpu.memory_space<vmem>>, vector<512x1xf32>
    %2 = vector.broadcast %1 : vector<512x1xf32> to vector<512x64xf32>
    %3 = arith.mulf %0, %2 : vector<512x64xf32>
    %c0_3 = arith.constant 0 : index
    %c0_4 = arith.constant 0 : index
    %4 = vector.load %arg3[%c0_3, %c0_4] : memref<64x32xf32, #tpu.memory_space<vmem>>, vector<64x32xf32>
    %cst = arith.constant dense<0.000000e+00> : vector<512x32xf32>
    %5 = tpu.matmul %3, %4, %cst {dimension_numbers = #tpu.dot_dimension_numbers<[1], [0], [0], [1], [0, 0, 1, 1], [], []>} : vector<512x64xf32>, vector<64x32xf32>, vector<512x32xf32> -> vector<512x32xf32>
    %c0_5 = arith.constant 0 : index
    %c0_6 = arith.constant 0 : index
    %6 = vector.load %arg4[%c0_5, %c0_6] : memref<1x32xf32, #tpu.memory_space<vmem>>, vector<1x32xf32>
    %7 = vector.broadcast %6 : vector<1x32xf32> to vector<512x32xf32>
    %8 = arith.addf %5, %7 : vector<512x32xf32>
    %cst_7 = arith.constant 0.000000e+00 : f32
    %9 = vector.broadcast %cst_7 : f32 to vector<512x32xf32>
    %10 = arith.maximumf %8, %9 : vector<512x32xf32>
    %c0_8 = arith.constant 0 : index
    %c0_9 = arith.constant 0 : index
    %11 = vector.load %arg5[%c0_8, %c0_9] : memref<1x32xf32, #tpu.memory_space<vmem>>, vector<1x32xf32>
    %12 = tpu.transpose %10, [1, 0] : vector<512x32xf32> -> vector<32x512xf32>
    %cst_10 = arith.constant dense<0.000000e+00> : vector<1x512xf32>
    %13 = tpu.matmul %11, %12, %cst_10 {dimension_numbers = #tpu.dot_dimension_numbers<[1], [0], [0], [1], [0, 0, 1, 1], [], []>} : vector<1x32xf32>, vector<32x512xf32>, vector<1x512xf32> -> vector<1x512xf32>
    %c0_11 = arith.constant 0 : index
    %c0_12 = arith.constant 0 : index
    %14 = memref.load %arg6[%c0_11, %c0_12] : memref<1x1xf32, #tpu.memory_space<smem>>
    %15 = vector.broadcast %14 : f32 to vector<1x512xf32>
    %16 = arith.addf %13, %15 : vector<1x512xf32>
    %17 = vector.shape_cast %16 : vector<1x512xf32> to vector<1x1x512xf32>
    %c0_13 = arith.constant 0 : index
    %c0_14 = arith.constant 0 : index
    %c0_15 = arith.constant 0 : index
    %18 = vector.load %arg7[%c0_13, %c0_14, %c0_15] : memref<1x1x512xf32, #tpu.memory_space<vmem>>, vector<1x1x512xf32>
    tpu.vector_store %arg7[%c0_13, %c0_14, %c0_15], %17 {strides = array<i32>} : memref<1x1x512xf32, #tpu.memory_space<vmem>>, vector<1x1x512xf32>,
    return
  }
  func.func @transform_0(%arg0: i32) -> (i32, i32) {
    %c0_i32 = arith.constant 0 : i32
    %c0_i32_0 = arith.constant 0 : i32
    return %arg0, %c0_i32 : i32, i32
  }
  func.func @transform_1(%arg0: i32) -> (i32, i32) {
    %c0_i32 = arith.constant 0 : i32
    %c0_i32_0 = arith.constant 0 : i32
    return %arg0, %c0_i32 : i32, i32
  }
  func.func @transform_2(%arg0: i32) -> (i32, i32) {
    %c0_i32 = arith.constant 0 : i32
    %c0_i32_0 = arith.constant 0 : i32
    %c0_i32_1 = arith.constant 0 : i32
    return %c0_i32, %c0_i32_0 : i32, i32
  }
  func.func @transform_3(%arg0: i32) -> (i32, i32) {
    %c0_i32 = arith.constant 0 : i32
    %c0_i32_0 = arith.constant 0 : i32
    %c0_i32_1 = arith.constant 0 : i32
    return %c0_i32, %c0_i32_0 : i32, i32
  }
  func.func @transform_4(%arg0: i32) -> (i32, i32) {
    %c0_i32 = arith.constant 0 : i32
    %c0_i32_0 = arith.constant 0 : i32
    %c0_i32_1 = arith.constant 0 : i32
    return %c0_i32, %c0_i32_0 : i32, i32
  }
  func.func @transform_5(%arg0: i32) -> (i32, i32) {
    %c0_i32 = arith.constant 0 : i32
    %c0_i32_0 = arith.constant 0 : i32
    %c0_i32_1 = arith.constant 0 : i32
    return %c0_i32, %c0_i32_0 : i32, i32
  }
  func.func @transform_6(%arg0: i32) -> (i32, i32, i32) {
    %c0_i32 = arith.constant 0 : i32
    %c0_i32_0 = arith.constant 0 : i32
    %c0_i32_1 = arith.constant 0 : i32
    return %arg0, %c0_i32, %c0_i32_0 : i32, i32, i32
  }
}

</mosaic_0001>

<bundles_post_ra>
// kernel: tpu_custom_call.1
= control target key start
LH: loop header
LB: loop body
LE: loop exit
PB: predicated region body
PF: predicated region fallthrough
CT: control target
= control target key end

     0   :  { %s3092_s0 = inlined_call_operand.vmem [shape: f32[2048,64], index: 0, kind: input, shape index: {}]   ;;  %s3093_s1 = inlined_call_operand.vmem [shape: f32[2048,1], index: 1, kind: input, shape index: {}]   ;;  %s3094_s2 = inlined_call_operand.vmem [shape: f32[64,32], index: 2, kind: input, shape index: {}]   ;;  %s3095_s3 = inlined_call_operand.vmem [shape: f32[1,32], index: 3, kind: input, shape index: {}]   ;;  %s3096_s4 = inlined_call_operand.vmem [shape: f32[1,32], index: 4, kind: input, shape index: {}]   ;;  %s3097_s5 = inlined_call_operand.<no memory space> [shape: f32[1,1], index: 5, kind: input, shape index: {}]   ;;  %s3098_s6 = inlined_call_operand.hbm [shape: f32[4,1,512], index: 6, kind: output, shape index: {}]  }
   0x1   :  { %11 = sst [smem:[#allocation2]] %s3097_s5 }
   0x2   :  { %12 = vsyncpa [#allocation4], 0 }
   0x3   :  { %14 = vsyncpa [#allocation4 + $0x1], 0  ;;  %s2563_s23 = smov 0   ;;  %s2565_s24 = smov 0  }
   0x4   :  { %s2567_s25 = smov 0   ;;  %s2569_s26 = smov 0  }
   0x5 LB: > { %s1904_s5 = sadd.s32 4294967295, %s2520_s26   ;;  %s1905_s27 = sadd.s32 4294967294, %s2520_s26   ;;  %s2520_s26 = sphi %s2569_s26, %s3106_s26   ;;  %s2516_s25 = sphi %s2567_s25, %s3105_s25   ;;  %s2512_s24 = sphi %s2565_s24, %s3104_s24   ;;  %s2508_s23 = sphi %s2563_s23, %s3103_s23  }
   0x6   : > { %s2586_s28 = sadd.s32 1, %s2520_s26   ;;  %s163_s29 = sadd.s32 1, %s2516_s25 }
   0x7   : > { %s160_s30 = ssub.s32 %s2520_s26, %s2586_s28  ;;  %p173_p0 = scmp.ne.s32.totalorder %s2516_s25, %s2512_s24 }
   0x8   : > { %p161_p1 = scmp.eq.s32.totalorder %s160_s30, 0  ;;  %p174_p2 = scmp.eq.s32.totalorder %s1904_s5, 3 }
   0x9   : > { %p179_p3 = scmp.ne.s32.totalorder %s2512_s24, %s2508_s23  ;;  %p180_p4 = scmp.eq.s32.totalorder %s1905_s27, 3 }
   0xa   : > { %s2596_s7 = scalar_select %p161_p1, %s2516_s25, %s163_s29  }
   0xb   : > { %p2598_p5 = por %p174_p2, %p173_p0  ;;  %p2602_p6 = por %p180_p4, %p179_p3 }
   0xc   : > { %p1908_p7 = scmp.ge.s32.totalorder %s2520_s26, 1  ;;  %p228_p8 = scmp.lt.s32.totalorder %s2520_s26, 5 }
   0xe   : > { %p229_p9 = pnand %p1908_p7, %p228_p8 }
   0xf   : > { %s2608_s10 = sshll.u32 (!%p229_p9), %s1904_s5, 6  ;;  %v787_v0 = vld [vmem:[%s3094_s2] sm:$0xff] (!%p229_p9)  ;;  %v788_v1 = vld [vmem:[%s3094_s2 + $0x8] sm:$0xff] (!%p229_p9)  ;;  %v789_v2 = vld [vmem:[%s3094_s2 + $0x10] sm:$0xff] (!%p229_p9)  ;;  %v2522_v3 = vmov (!%p229_p9), 0   ;;  %vm802_vm0 = vcmask (!%p229_p9), 523264  }
  0x10   : > { %232 = sbr.rel (%p229_p9) target bundleno = 778 (0x30a), region = 44  ;;  %2457 = vset.pattern.permute.xlu1 (!%p229_p9), %v2522_v3  ;;  %2456 = vset.pattern.permute.xlu0 (!%p229_p9), %v2522_v3  ;;  %p264_p10 = scmp.lt.s32.totalorder (!%p229_p9), %s2608_s10, 255  ;;  %v2303_v4 = vpack.c.bf16 (!%p229_p9), %v788_v1, %v787_v0  ;;  %v790_v5 = vld [vmem:[%s3094_s2 + $0x18] sm:$0xff] (!%p229_p9)  ;;  %v791_v7 = vld [vmem:[%s3094_s2 + $0x20] sm:$0xff] (!%p229_p9)  ;;  %v792_v8 = vld [vmem:[%s3094_s2 + $0x28] sm:$0xff] (!%p229_p9)  ;;  %vm1447_vm1 = vcmask (!%p229_p9), 261120  }
  0x11   : > { %v2307_v6 = vpack.c.bf16 (!%p229_p9), %v790_v5, %v789_v2  ;;  %v2311_v9 = vpack.c.bf16 (!%p229_p9), %v792_v8, %v791_v7  ;;  %v793_v24 = vld [vmem:[%s3094_s2 + $0x30] sm:$0xff] (!%p229_p9)  ;;  %v794_v25 = vld [vmem:[%s3094_s2 + $0x38] sm:$0xff] (!%p229_p9)  ;;  %vm2894_vm2 = vmpackc.low (!%p229_p9), %vm1447_vm1, %vm1447_vm1  ;;  %s1445_s5 = sld [smem:[#allocation2]] (!%p229_p9)  ;;  %s3050_s14 = scalar_lea.hbm (!%p229_p9), %s3098_s6, %s2608_s10 }
  0x12   : > { %2304 = vmatprep.subr.bf16.mxu0 (!%p229_p9), %v2303_v4  ;;  %v2315_v26 = vpack.c.bf16 (!%p229_p9), %v794_v25, %v793_v24  ;;  %s2524_s17 = smov (!%p229_p9), [#allocation3]  }
  0x13   : > { %2306 = vmatpush3.bf16.msra.mxu0 (!%p229_p9), %v2303_v4 }
  0x14   : > { %2308 = vmatprep.subr.bf16.mxu0 (!%p229_p9), %v2307_v6 }
  0x17   : > { %s2624_s19 = scalar_select %p264_p10, %s2608_s10, 255  ;;  %2310 = vmatpush3.bf16.msra.mxu0 %v2307_v6 }
  0x18   : > { %2312 = vmatprep.subr.bf16.mxu0 %v2311_v9 }
  0x19   : > { %s1911_s27 = sshll.u32 %s2624_s19, 3 }
  0x1a   : > { %s2638_s11 = scalar_lea.vmem %s3093_s1, %s1911_s27  ;;  %s2715_s18 = scalar_lea.vmem %s3092_s0, %s1911_s27 }
  0x1b   : > { %v341_v10 = vld [vmem:[%s2638_s11 + $0x10] sm:$0xff]  ;;  %v339_v11 = vld [vmem:[%s2638_s11] sm:$0xff]  ;;  %v342_v12 = vld [vmem:[%s2638_s11 + $0x18] sm:$0xff]  ;;  %2314 = vmatpush3.bf16.msra.mxu0 %v2311_v9  ;;  %s260_s27 = sand.u32 1, %s2512_s24  }
  0x1c   : > { %415 = vperm.xlu1 %2457, %v341_v10   ;;  %405 = vperm.xlu0 %2456, %v339_v11   ;;  %v340_v13 = vld [vmem:[%s2638_s11 + $0x8] sm:$0xff]  ;;  %v343_v15 = vld [vmem:[%s2638_s11 + $0x20] sm:$0xff]  ;;  %v346_v16 = vld [vmem:[%s2638_s11 + $0x38] sm:$0xff]  ;;  %s1909_s29 = sshll.u32 %s260_s27, 2  ;;  %s1820_s15 = scalar_lea.sflag [#allocation4], %s260_s27 }
  0x1d   : > { %v344_v14 = vld [vmem:[%s2638_s11 + $0x28] sm:$0xff]  ;;  %v345_v17 = vld [vmem:[%s2638_s11 + $0x30] sm:$0xff]  ;;  %v347_v19 = vld [vmem:[%s2638_s11 + $0x40] sm:$0xff]  ;;  %2316 = vmatprep.subr.bf16.mxu0 %v2315_v26  ;;  %s262_s30 = scalar_lea.vmem [#allocation3], %s1909_s29 }
  0x1e   : > { %v348_v18 = vld [vmem:[%s2638_s11 + $0x48] sm:$0xff]  ;;  %v350_v20 = vld [vmem:[%s2638_s11 + $0x58] sm:$0xff]  ;;  %v349_v21 = vld [vmem:[%s2638_s11 + $0x50] sm:$0xff] }
  0x1f   : > { %v352_v22 = vld [vmem:[%s2638_s11 + $0x68] sm:$0xff]  ;;  %v351_v23 = vld [vmem:[%s2638_s11 + $0x60] sm:$0xff]  ;;  %v354_v27 = vld [vmem:[%s2638_s11 + $0x78] sm:$0xff]  ;;  %2318 = vmatpush3.bf16.msra.mxu0 %v2315_v26 }
  0x20   : > { %420 = vperm.xlu1 %2457, %v342_v12   ;;  %410 = vperm.xlu0 %2456, %v340_v13   ;;  %v353_v28 = vld [vmem:[%s2638_s11 + $0x70] sm:$0xff]  ;;  %v356_v29 = vld [vmem:[%s2638_s11 + $0x88] sm:$0xff]  ;;  %v355_v30 = vld [vmem:[%s2638_s11 + $0x80] sm:$0xff] }
  0x21   : > { %v358_v31 = vld [vmem:[%s2638_s11 + $0x98] sm:$0xff]  ;;  %v357_v32 = vld [vmem:[%s2638_s11 + $0x90] sm:$0xff]  ;;  %v360_v33 = vld [vmem:[%s2638_s11 + $0xa8] sm:$0xff] }
  0x22   : > { %v359_v34 = vld [vmem:[%s2638_s11 + $0xa0] sm:$0xff]  ;;  %v362_v35 = vld [vmem:[%s2638_s11 + $0xb8] sm:$0xff]  ;;  %v361_v36 = vld [vmem:[%s2638_s11 + $0xb0] sm:$0xff] }
  0x23   : > { %v364_v37 = vld [vmem:[%s2638_s11 + $0xc8] sm:$0xff]  ;;  %v363_v38 = vld [vmem:[%s2638_s11 + $0xc0] sm:$0xff]  ;;  %v366_v39 = vld [vmem:[%s2638_s11 + $0xd8] sm:$0xff] }
  0x24   : > { %430 = vperm.xlu1 %2457, %v344_v14   ;;  %425 = vperm.xlu0 %2456, %v343_v15   ;;  %v365_v40 = vld [vmem:[%s2638_s11 + $0xd0] sm:$0xff]  ;;  %v368_v41 = vld [vmem:[%s2638_s11 + $0xe8] sm:$0xff]  ;;  %v367_v42 = vld [vmem:[%s2638_s11 + $0xe0] sm:$0xff] }
  0x25   : > { %v370_v43 = vld [vmem:[%s2638_s11 + $0xf8] sm:$0xff]  ;;  %v369_v44 = vld [vmem:[%s2638_s11 + $0xf0] sm:$0xff]  ;;  %v372_v45 = vld [vmem:[%s2638_s11 + $0x108] sm:$0xff] }
  0x26   : > { %v371_v46 = vld [vmem:[%s2638_s11 + $0x100] sm:$0xff]  ;;  %v374_v47 = vld [vmem:[%s2638_s11 + $0x118] sm:$0xff]  ;;  %v373_v48 = vld [vmem:[%s2638_s11 + $0x110] sm:$0xff] }
  0x27   : > { %v376_v49 = vld [vmem:[%s2638_s11 + $0x128] sm:$0xff]  ;;  %v375_v50 = vld [vmem:[%s2638_s11 + $0x120] sm:$0xff]  ;;  %v378_v51 = vld [vmem:[%s2638_s11 + $0x138] sm:$0xff] }
  0x28   : > { %440 = vperm.xlu1 %2457, %v346_v16   ;;  %435 = vperm.xlu0 %2456, %v345_v17   ;;  %v377_v52 = vld [vmem:[%s2638_s11 + $0x130] sm:$0xff]  ;;  %v380_v53 = vld [vmem:[%s2638_s11 + $0x148] sm:$0xff]  ;;  %v379_v54 = vld [vmem:[%s2638_s11 + $0x140] sm:$0xff] }
  0x29   : > { %v382_v55 = vld [vmem:[%s2638_s11 + $0x158] sm:$0xff]  ;;  %v381_v56 = vld [vmem:[%s2638_s11 + $0x150] sm:$0xff]  ;;  %v384_v57 = vld [vmem:[%s2638_s11 + $0x168] sm:$0xff] }
  0x2a   : > { %v383_v58 = vld [vmem:[%s2638_s11 + $0x160] sm:$0xff]  ;;  %v386_v59 = vld [vmem:[%s2638_s11 + $0x178] sm:$0xff]  ;;  %v385_v60 = vld [vmem:[%s2638_s11 + $0x170] sm:$0xff] }
  0x2b   : > { %v388_v61 = vld [vmem:[%s2638_s11 + $0x188] sm:$0xff]  ;;  %v387_v62 = vld [vmem:[%s2638_s11 + $0x180] sm:$0xff]  ;;  %v390_v63 = vld [vmem:[%s2638_s11 + $0x198] sm:$0xff] }
  0x2c   : > { %450 = vperm.xlu1 %2457, %v348_v18   ;;  %445 = vperm.xlu0 %2456, %v347_v19   ;;  %v389_v0 = vld [vmem:[%s2638_s11 + $0x190] sm:$0xff]  ;;  %v392_v1 = vld [vmem:[%s2638_s11 + $0x1a8] sm:$0xff]  ;;  %v391_v2 = vld [vmem:[%s2638_s11 + $0x1a0] sm:$0xff] }
  0x2d   : > { %v394_v3 = vld [vmem:[%s2638_s11 + $0x1b8] sm:$0xff]  ;;  %v393_v4 = vld [vmem:[%s2638_s11 + $0x1b0] sm:$0xff]  ;;  %v396_v5 = vld [vmem:[%s2638_s11 + $0x1c8] sm:$0xff] }
  0x2e   : > { %v395_v6 = vld [vmem:[%s2638_s11 + $0x1c0] sm:$0xff]  ;;  %v398_v7 = vld [vmem:[%s2638_s11 + $0x1d8] sm:$0xff]  ;;  %v397_v8 = vld [vmem:[%s2638_s11 + $0x1d0] sm:$0xff] }
  0x2f   : > { %v400_v9 = vld [vmem:[%s2638_s11 + $0x1e8] sm:$0xff]  ;;  %v399_v10 = vld [vmem:[%s2638_s11 + $0x1e0] sm:$0xff]  ;;  %v402_v11 = vld [vmem:[%s2638_s11 + $0x1f8] sm:$0xff] }
  0x30   : > { %460 = vperm.xlu1 %2457, %v350_v20   ;;  %455 = vperm.xlu0 %2456, %v349_v21   ;;  %v401_v12 = vld [vmem:[%s2638_s11 + $0x1f0] sm:$0xff]  ;;  %v275_v13 = vld [vmem:[%s2715_s18] sm:$0xff]  ;;  %v276_v18 = vld [vmem:[%s2715_s18 + $0x8] sm:$0xff]  ;;  %s1834_s11 = sshll.u32 %s262_s30, 4  ;;  %s3052_s11 = int_to_ptr.vmem [resolvable:$true] %s1834_s11 }
  0x31   : > { %v277_v16 = vld [vmem:[%s2715_s18 + $0x10] sm:$0xff]  ;;  %v279_v24 = vld [vmem:[%s2715_s18 + $0x20] sm:$0xff]  ;;  %s2458_s16 = scalar_lea.vmem %s3052_s11, 64 }
  0x32   : > { %p2459_p11 = scmp.ne.s32.totalorder %s3052_s11, %s2458_s16 }
  0x34   : > { %470 = vperm.xlu1 %2457, %v352_v22   ;;  %465 = vperm.xlu0 %2456, %v351_v23   ;;  %v278_v23 = vld [vmem:[%s2715_s18 + $0x18] sm:$0xff]  ;;  %p2460_p12 = pnand %p2459_p11, %p2598_p5 }
  0x36   : > { %p2461_p13 = pneg %p2460_p12 }
  0x38   : > { %480 = vperm.xlu1 %2457, %v354_v27   ;;  %475 = vperm.xlu0 %2456, %v353_v28  }
  0x3c   : > { %490 = vperm.xlu1 %2457, %v356_v29   ;;  %485 = vperm.xlu0 %2456, %v355_v30   ;;  %v280_v29 = vld [vmem:[%s2715_s18 + $0x28] sm:$0xff]  ;;  %v281_v30 = vld [vmem:[%s2715_s18 + $0x30] sm:$0xff] }
  0x40   : > { %500 = vperm.xlu1 %2457, %v358_v31   ;;  %495 = vperm.xlu0 %2456, %v357_v32  }
  0x44   : > { %510 = vperm.xlu1 %2457, %v360_v33   ;;  %505 = vperm.xlu0 %2456, %v359_v34  }
  0x48   : > { %520 = vperm.xlu1 %2457, %v362_v35   ;;  %515 = vperm.xlu0 %2456, %v361_v36   ;;  %v282_v35 = vld [vmem:[%s2715_s18 + $0x38] sm:$0xff]  ;;  %v283_v36 = vld [vmem:[%s2715_s18 + $0x40] sm:$0xff] }
  0x4c   : > { %530 = vperm.xlu1 %2457, %v364_v37   ;;  %525 = vperm.xlu0 %2456, %v363_v38  }
  0x50   : > { %540 = vperm.xlu1 %2457, %v366_v39   ;;  %535 = vperm.xlu0 %2456, %v365_v40  }
  0x54   : > { %550 = vperm.xlu1 %2457, %v368_v41   ;;  %545 = vperm.xlu0 %2456, %v367_v42   ;;  %v284_v41 = vld [vmem:[%s2715_s18 + $0x48] sm:$0xff]  ;;  %v285_v42 = vld [vmem:[%s2715_s18 + $0x50] sm:$0xff] }
  0x58   : > { %560 = vperm.xlu1 %2457, %v370_v43   ;;  %555 = vperm.xlu0 %2456, %v369_v44  }
  0x5c   : > { %570 = vperm.xlu1 %2457, %v372_v45   ;;  %565 = vperm.xlu0 %2456, %v371_v46  }
  0x60   : > { %580 = vperm.xlu1 %2457, %v374_v47   ;;  %575 = vperm.xlu0 %2456, %v373_v48   ;;  %v286_v47 = vld [vmem:[%s2715_s18 + $0x58] sm:$0xff]  ;;  %v287_v48 = vld [vmem:[%s2715_s18 + $0x60] sm:$0xff] }
  0x64   : > { %590 = vperm.xlu1 %2457, %v376_v49   ;;  %585 = vperm.xlu0 %2456, %v375_v50  }
  0x68   : > { %600 = vperm.xlu1 %2457, %v378_v51   ;;  %595 = vperm.xlu0 %2456, %v377_v52  }
  0x6c   : > { %610 = vperm.xlu1 %2457, %v380_v53   ;;  %605 = vperm.xlu0 %2456, %v379_v54   ;;  %v288_v53 = vld [vmem:[%s2715_s18 + $0x68] sm:$0xff]  ;;  %v289_v54 = vld [vmem:[%s2715_s18 + $0x70] sm:$0xff] }
  0x70   : > { %620 = vperm.xlu1 %2457, %v382_v55   ;;  %615 = vperm.xlu0 %2456, %v381_v56  }
  0x74   : > { %630 = vperm.xlu1 %2457, %v384_v57   ;;  %625 = vperm.xlu0 %2456, %v383_v58  }
  0x78   : > { %640 = vperm.xlu1 %2457, %v386_v59   ;;  %635 = vperm.xlu0 %2456, %v385_v60   ;;  %v290_v59 = vld [vmem:[%s2715_s18 + $0x78] sm:$0xff]  ;;  %v291_v60 = vld [vmem:[%s2715_s18 + $0x80] sm:$0xff] }
  0x7c   : > { %650 = vperm.xlu1 %2457, %v388_v61   ;;  %645 = vperm.xlu0 %2456, %v387_v62  }
  0x80   : > { %660 = vperm.xlu1 %2457, %v390_v63   ;;  %655 = vperm.xlu0 %2456, %v389_v0  }
  0x84   : > { %670 = vperm.xlu1 %2457, %v392_v1   ;;  %665 = vperm.xlu0 %2456, %v391_v2   ;;  %v292_v1 = vld [vmem:[%s2715_s18 + $0x88] sm:$0xff]  ;;  %v293_v2 = vld [vmem:[%s2715_s18 + $0x90] sm:$0xff] }
  0x88   : > { %680 = vperm.xlu1 %2457, %v394_v3   ;;  %675 = vperm.xlu0 %2456, %v393_v4  }
  0x8c   : > { %690 = vperm.xlu1 %2457, %v396_v5   ;;  %685 = vperm.xlu0 %2456, %v395_v6  }
  0x90   : > { %700 = vperm.xlu1 %2457, %v398_v7   ;;  %695 = vperm.xlu0 %2456, %v397_v8   ;;  %v294_v7 = vld [vmem:[%s2715_s18 + $0x98] sm:$0xff]  ;;  %v295_v8 = vld [vmem:[%s2715_s18 + $0xa0] sm:$0xff] }
  0x94   : > { %710 = vperm.xlu1 %2457, %v400_v9   ;;  %705 = vperm.xlu0 %2456, %v399_v10  }
  0x98   : > { %720 = vperm.xlu1 %2457, %v402_v11   ;;  %715 = vperm.xlu0 %2456, %v401_v12  }
  0x9b   : > { %v416_v14 = vpop.permute.xlu1 %415  ;;  %v406_v15 = vpop.permute.xlu0 %405 }
  0x9c   : > { %v723_v17 = vmul.f32 %v406_v15, %v275_v13  ;;  %v725_v19 = vmul.f32 %v416_v14, %v277_v16  ;;  %v296_v13 = vld [vmem:[%s2715_s18 + $0xa8] sm:$0xff]  ;;  %v297_v14 = vld [vmem:[%s2715_s18 + $0xb0] sm:$0xff] }
  0x9e   : > { %2207 = vmatprep.mubr.msk.f32.mxu0 %vm802_vm0, %v723_v17 }
  0x9f   : > { %v421_v20 = vpop.permute.xlu1 %420  ;;  %v411_v21 = vpop.permute.xlu0 %410 }
  0xa0   : > { %v724_v22 = vmul.f32 %v411_v21, %v276_v18  ;;  %v726_v27 = vmul.f32 %v421_v20, %v278_v23  ;;  %v299_v20 = vld [vmem:[%s2715_s18 + $0xc0] sm:$0xff] }
  0xa2   : > { %2208 = vmatmul.mubr.msk.f32.vlgmr.msra.gmra.mrb[0].mxu0 %vm802_vm0, %v724_v22 }
  0xa3   : > { %v431_v25 = vpop.permute.xlu1 %430  ;;  %v426_v26 = vpop.permute.xlu0 %425  ;;  %2210 = vmatprep.mubr.msk.f32.mxu0 %vm802_vm0, %v725_v19  ;;  %v298_v19 = vld [vmem:[%s2715_s18 + $0xb8] sm:$0xff] }
  0xa4   : > { %v727_v28 = vmul.f32 %v426_v26, %v279_v24  ;;  %v728_v33 = vmul.f32 %v431_v25, %v280_v29  ;;  %v300_v25 = vld [vmem:[%s2715_s18 + $0xc8] sm:$0xff]  ;;  %v301_v26 = vld [vmem:[%s2715_s18 + $0xd0] sm:$0xff] }
  0xa6   : > { %2211 = vmatmul.mubr.msk.f32.gmra.mrb[2].mxu0 %vm802_vm0, %v726_v27 }
  0xa7   : > { %v441_v31 = vpop.permute.xlu1 %440  ;;  %v436_v32 = vpop.permute.xlu0 %435  ;;  %2213 = vmatprep.mubr.msk.f32.mxu0 %vm802_vm0, %v727_v28 }
  0xa8   : > { %v729_v34 = vmul.f32 %v436_v32, %v281_v30  ;;  %v730_v39 = vmul.f32 %v441_v31, %v282_v35  ;;  %v302_v31 = vld [vmem:[%s2715_s18 + $0xd8] sm:$0xff]  ;;  %v303_v32 = vld [vmem:[%s2715_s18 + $0xe0] sm:$0xff] }
  0xaa   : > { %2214 = vmatmul.mubr.msk.f32.gmra.mrb[4].mxu0 %vm802_vm0, %v728_v33 }
  0xab   : > { %v451_v37 = vpop.permute.xlu1 %450  ;;  %v446_v38 = vpop.permute.xlu0 %445  ;;  %2216 = vmatprep.mubr.msk.f32.mxu0 %vm802_vm0, %v729_v34 }
  0xac   : > { %v731_v40 = vmul.f32 %v446_v38, %v283_v36  ;;  %v732_v45 = vmul.f32 %v451_v37, %v284_v41  ;;  %v304_v37 = vld [vmem:[%s2715_s18 + $0xe8] sm:$0xff]  ;;  %v305_v38 = vld [vmem:[%s2715_s18 + $0xf0] sm:$0xff] }
  0xae   : > { %2217 = vmatmul.mubr.msk.f32.gmra.mrb[6].mxu0 %vm802_vm0, %v730_v39 }
  0xaf   : > { %v461_v43 = vpop.permute.xlu1 %460  ;;  %v456_v44 = vpop.permute.xlu0 %455  ;;  %2219 = vmatprep.mubr.msk.f32.mxu0 %vm802_vm0, %v731_v40 }
  0xb0   : > { %v733_v46 = vmul.f32 %v456_v44, %v285_v42  ;;  %v734_v51 = vmul.f32 %v461_v43, %v286_v47  ;;  %v306_v43 = vld [vmem:[%s2715_s18 + $0xf8] sm:$0xff]  ;;  %v307_v44 = vld [vmem:[%s2715_s18 + $0x100] sm:$0xff] }
  0xb2   : > { %2220 = vmatmul.mubr.msk.f32.gmra.mrb[8].mxu0 %vm802_vm0, %v732_v45 }
  0xb3   : > { %v471_v49 = vpop.permute.xlu1 %470  ;;  %v466_v50 = vpop.permute.xlu0 %465  ;;  %2222 = vmatprep.mubr.msk.f32.mxu0 %vm802_vm0, %v733_v46 }
  0xb4   : > { %v735_v52 = vmul.f32 %v466_v50, %v287_v48  ;;  %v736_v57 = vmul.f32 %v471_v49, %v288_v53  ;;  %v308_v49 = vld [vmem:[%s2715_s18 + $0x108] sm:$0xff]  ;;  %v309_v50 = vld [vmem:[%s2715_s18 + $0x110] sm:$0xff] }
  0xb6   : > { %2223 = vmatmul.mubr.msk.f32.gmra.mrb[10].mxu0 %vm802_vm0, %v734_v51 }
  0xb7   : > { %v481_v55 = vpop.permute.xlu1 %480  ;;  %v476_v56 = vpop.permute.xlu0 %475  ;;  %2225 = vmatprep.mubr.msk.f32.mxu0 %vm802_vm0, %v735_v52 }
  0xb8   : > { %v737_v58 = vmul.f32 %v476_v56, %v289_v54  ;;  %v738_v63 = vmul.f32 %v481_v55, %v290_v59  ;;  %v310_v55 = vld [vmem:[%s2715_s18 + $0x118] sm:$0xff]  ;;  %v311_v56 = vld [vmem:[%s2715_s18 + $0x120] sm:$0xff] }
  0xba   : > { %2226 = vmatmul.mubr.msk.f32.gmra.mrb[12].mxu0 %vm802_vm0, %v736_v57 }
  0xbb   : > { %v491_v61 = vpop.permute.xlu1 %490  ;;  %v486_v62 = vpop.permute.xlu0 %485  ;;  %2228 = vmatprep.mubr.msk.f32.mxu0 %vm802_vm0, %v737_v58 }
  0xbc   : > { %v739_v0 = vmul.f32 %v486_v62, %v291_v60  ;;  %v740_v5 = vmul.f32 %v491_v61, %v292_v1  ;;  %v312_v61 = vld [vmem:[%s2715_s18 + $0x128] sm:$0xff]  ;;  %v313_v62 = vld [vmem:[%s2715_s18 + $0x130] sm:$0xff] }
  0xbe   : > { %2229 = vmatmul.mubr.msk.f32.gmra.mrb[14].mxu0 %vm802_vm0, %v738_v63 }
  0xbf   : > { %v501_v3 = vpop.permute.xlu1 %500  ;;  %v496_v4 = vpop.permute.xlu0 %495  ;;  %2231 = vmatprep.mubr.msk.f32.mxu0 %vm802_vm0, %v739_v0 }
  0xc0   : > { %v741_v6 = vmul.f32 %v496_v4, %v293_v2  ;;  %v742_v11 = vmul.f32 %v501_v3, %v294_v7  ;;  %v314_v3 = vld [vmem:[%s2715_s18 + $0x138] sm:$0xff]  ;;  %v315_v4 = vld [vmem:[%s2715_s18 + $0x140] sm:$0xff] }
  0xc2   : > { %2232 = vmatmul.mubr.msk.f32.gmra.mrb[16].mxu0 %vm802_vm0, %v740_v5 }
  0xc3   : > { %v511_v9 = vpop.permute.xlu1 %510  ;;  %v506_v10 = vpop.permute.xlu0 %505  ;;  %2234 = vmatprep.mubr.msk.f32.mxu0 %vm802_vm0, %v741_v6 }
  0xc4   : > { %v743_v12 = vmul.f32 %v506_v10, %v295_v8  ;;  %v744_v17 = vmul.f32 %v511_v9, %v296_v13  ;;  %v316_v9 = vld [vmem:[%s2715_s18 + $0x148] sm:$0xff]  ;;  %v317_v10 = vld [vmem:[%s2715_s18 + $0x150] sm:$0xff] }
  0xc6   : > { %2235 = vmatmul.mubr.msk.f32.gmra.mrb[18].mxu0 %vm802_vm0, %v742_v11 }
  0xc7   : > { %v521_v15 = vpop.permute.xlu1 %520  ;;  %v516_v16 = vpop.permute.xlu0 %515  ;;  %2237 = vmatprep.mubr.msk.f32.mxu0 %vm802_vm0, %v743_v12 }
  0xc8   : > { %v745_v18 = vmul.f32 %v516_v16, %v297_v14  ;;  %v746_v23 = vmul.f32 %v521_v15, %v298_v19  ;;  %v318_v15 = vld [vmem:[%s2715_s18 + $0x158] sm:$0xff]  ;;  %v319_v16 = vld [vmem:[%s2715_s18 + $0x160] sm:$0xff] }
  0xca   : > { %2238 = vmatmul.mubr.msk.f32.gmra.mrb[20].mxu0 %vm802_vm0, %v744_v17 }
  0xcb   : > { %v531_v21 = vpop.permute.xlu1 %530  ;;  %v526_v22 = vpop.permute.xlu0 %525  ;;  %2240 = vmatprep.mubr.msk.f32.mxu0 %vm802_vm0, %v745_v18 }
  0xcc   : > { %v747_v24 = vmul.f32 %v526_v22, %v299_v20  ;;  %v748_v29 = vmul.f32 %v531_v21, %v300_v25  ;;  %v320_v21 = vld [vmem:[%s2715_s18 + $0x168] sm:$0xff]  ;;  %v321_v22 = vld [vmem:[%s2715_s18 + $0x170] sm:$0xff] }
  0xce   : > { %2241 = vmatmul.mubr.msk.f32.gmra.mrb[22].mxu0 %vm802_vm0, %v746_v23 }
  0xcf   : > { %v541_v27 = vpop.permute.xlu1 %540  ;;  %v536_v28 = vpop.permute.xlu0 %535  ;;  %2243 = vmatprep.mubr.msk.f32.mxu0 %vm802_vm0, %v747_v24 }
  0xd0   : > { %v749_v30 = vmul.f32 %v536_v28, %v301_v26  ;;  %v750_v35 = vmul.f32 %v541_v27, %v302_v31  ;;  %v322_v27 = vld [vmem:[%s2715_s18 + $0x178] sm:$0xff]  ;;  %v323_v28 = vld [vmem:[%s2715_s18 + $0x180] sm:$0xff] }
  0xd2   : > { %2244 = vmatmul.mubr.msk.f32.gmra.mrb[24].mxu0 %vm802_vm0, %v748_v29 }
  0xd3   : > { %v551_v33 = vpop.permute.xlu1 %550  ;;  %v546_v34 = vpop.permute.xlu0 %545  ;;  %2246 = vmatprep.mubr.msk.f32.mxu0 %vm802_vm0, %v749_v30 }
  0xd4   : > { %v751_v36 = vmul.f32 %v546_v34, %v303_v32  ;;  %v752_v41 = vmul.f32 %v551_v33, %v304_v37  ;;  %v324_v33 = vld [vmem:[%s2715_s18 + $0x188] sm:$0xff]  ;;  %v325_v34 = vld [vmem:[%s2715_s18 + $0x190] sm:$0xff] }
  0xd6   : > { %2247 = vmatmul.mubr.msk.f32.gmra.mrb[26].mxu0 %vm802_vm0, %v750_v35 }
  0xd7   : > { %v561_v39 = vpop.permute.xlu1 %560  ;;  %v556_v40 = vpop.permute.xlu0 %555  ;;  %2249 = vmatprep.mubr.msk.f32.mxu0 %vm802_vm0, %v751_v36 }
  0xd8   : > { %v753_v42 = vmul.f32 %v556_v40, %v305_v38  ;;  %v754_v47 = vmul.f32 %v561_v39, %v306_v43  ;;  %v326_v39 = vld [vmem:[%s2715_s18 + $0x198] sm:$0xff]  ;;  %v327_v40 = vld [vmem:[%s2715_s18 + $0x1a0] sm:$0xff] }
  0xda   : > { %2250 = vmatmul.mubr.msk.f32.gmra.mrb[28].mxu0 %vm802_vm0, %v752_v41 }
  0xdb   : > { %v571_v45 = vpop.permute.xlu1 %570  ;;  %v566_v46 = vpop.permute.xlu0 %565  ;;  %2252 = vmatprep.mubr.msk.f32.mxu0 %vm802_vm0, %v753_v42 }
  0xdc   : > { %v755_v48 = vmul.f32 %v566_v46, %v307_v44  ;;  %v756_v53 = vmul.f32 %v571_v45, %v308_v49  ;;  %v328_v45 = vld [vmem:[%s2715_s18 + $0x1a8] sm:$0xff]  ;;  %v329_v46 = vld [vmem:[%s2715_s18 + $0x1b0] sm:$0xff] }
  0xde   : > { %2253 = vmatmul.mubr.msk.f32.gmra.mrb[30].mxu0 %vm802_vm0, %v754_v47 }
  0xdf   : > { %v581_v51 = vpop.permute.xlu1 %580  ;;  %v576_v52 = vpop.permute.xlu0 %575  ;;  %2255 = vmatprep.mubr.msk.f32.mxu0 %vm802_vm0, %v755_v48 }
  0xe0   : > { %v757_v54 = vmul.f32 %v576_v52, %v309_v50  ;;  %v758_v59 = vmul.f32 %v581_v51, %v310_v55  ;;  %v330_v51 = vld [vmem:[%s2715_s18 + $0x1b8] sm:$0xff]  ;;  %v331_v52 = vld [vmem:[%s2715_s18 + $0x1c0] sm:$0xff] }
  0xe2   : > { %2256 = vmatmul.mubr.msk.f32.gmra.mrb[32].mxu0 %vm802_vm0, %v756_v53 }
  0xe3   : > { %v591_v57 = vpop.permute.xlu1 %590  ;;  %v586_v58 = vpop.permute.xlu0 %585  ;;  %2258 = vmatprep.mubr.msk.f32.mxu0 %vm802_vm0, %v757_v54 }
  0xe4   : > { %v759_v60 = vmul.f32 %v586_v58, %v311_v56  ;;  %v760_v1 = vmul.f32 %v591_v57, %v312_v61  ;;  %v332_v57 = vld [vmem:[%s2715_s18 + $0x1c8] sm:$0xff]  ;;  %v333_v58 = vld [vmem:[%s2715_s18 + $0x1d0] sm:$0xff] }
  0xe6   : > { %2259 = vmatmul.mubr.msk.f32.gmra.mrb[34].mxu0 %vm802_vm0, %v758_v59 }
  0xe7   : > { %v601_v63 = vpop.permute.xlu1 %600  ;;  %v596_v0 = vpop.permute.xlu0 %595  ;;  %2261 = vmatprep.mubr.msk.f32.mxu0 %vm802_vm0, %v759_v60 }
  0xe8   : > { %v761_v2 = vmul.f32 %v596_v0, %v313_v62  ;;  %v762_v7 = vmul.f32 %v601_v63, %v314_v3  ;;  %v334_v63 = vld [vmem:[%s2715_s18 + $0x1d8] sm:$0xff]  ;;  %v335_v0 = vld [vmem:[%s2715_s18 + $0x1e0] sm:$0xff] }
  0xea   : > { %2262 = vmatmul.mubr.msk.f32.gmra.mrb[36].mxu0 %vm802_vm0, %v760_v1 }
  0xeb   : > { %v611_v5 = vpop.permute.xlu1 %610  ;;  %v606_v6 = vpop.permute.xlu0 %605  ;;  %2264 = vmatprep.mubr.msk.f32.mxu0 %vm802_vm0, %v761_v2 }
  0xec   : > { %v763_v8 = vmul.f32 %v606_v6, %v315_v4  ;;  %v764_v13 = vmul.f32 %v611_v5, %v316_v9  ;;  %v336_v5 = vld [vmem:[%s2715_s18 + $0x1e8] sm:$0xff]  ;;  %v337_v6 = vld [vmem:[%s2715_s18 + $0x1f0] sm:$0xff] }
  0xee   : > { %2265 = vmatmul.mubr.msk.f32.gmra.mrb[38].mxu0 %vm802_vm0, %v762_v7 }
  0xef   : > { %v621_v11 = vpop.permute.xlu1 %620  ;;  %v616_v12 = vpop.permute.xlu0 %615  ;;  %2267 = vmatprep.mubr.msk.f32.mxu0 %vm802_vm0, %v763_v8 }
  0xf0   : > { %v765_v14 = vmul.f32 %v616_v12, %v317_v10  ;;  %v766_v19 = vmul.f32 %v621_v11, %v318_v15  ;;  %v338_v11 = vld [vmem:[%s2715_s18 + $0x1f8] sm:$0xff]  ;;  %s2462_s18 = sshll.u32 %s2524_s17, 4  ;;  %s2463_s18 = int_to_ptr.vmem [resolvable:$false] %s2462_s18 }
  0xf1   : > { %s2464_s19 = scalar_lea.vmem %s2463_s18, 128  ;;  %p2465_p0 = scmp.lt.s32.totalorder %s3052_s11, %s2463_s18 }
  0xf2   : > { %2268 = vmatmul.mubr.msk.f32.gmra.mrb[40].mxu0 %vm802_vm0, %v764_v13  ;;  %v2848_v13 = vld [vmem:[%s3096_s4] sm:$0x1]  ;;  %p2466_p1 = scmp.lt.s32.totalorder %s2464_s19, %s2458_s16 }
  0xf3   : > { %v631_v17 = vpop.permute.xlu1 %630  ;;  %v626_v18 = vpop.permute.xlu0 %625  ;;  %2270 = vmatprep.mubr.msk.f32.mxu0 %vm802_vm0, %v765_v14  ;;  %2155 = vmatprep.mubr.msk.f32.mxu1 %vm1447_vm1, %v2848_v13  ;;  %v2855_v14 = vld [vmem:[%s3095_s3] ss:$0 sm:$0xff] }
  0xf4   : > { %v767_v20 = vmul.f32 %v626_v18, %v319_v16  ;;  %v768_v25 = vmul.f32 %v631_v17, %v320_v21  ;;  %p2467_p2 = por %p2466_p1, %p2465_p0 }
  0xf6   : > { %2271 = vmatmul.mubr.msk.f32.gmra.mrb[42].mxu0 %vm802_vm0, %v766_v19  ;;  %p2468_p3 = pnand %p2467_p2, %p2461_p13 }
  0xf7   : > { %v641_v23 = vpop.permute.xlu1 %640  ;;  %v636_v24 = vpop.permute.xlu0 %635  ;;  %2273 = vmatprep.mubr.msk.f32.mxu0 %vm802_vm0, %v767_v20 }
  0xf8   : > { %v769_v26 = vmul.f32 %v636_v24, %v321_v22  ;;  %v770_v31 = vmul.f32 %v641_v23, %v322_v27 }
  0xfa   : > { %2274 = vmatmul.mubr.msk.f32.gmra.mrb[44].mxu0 %vm802_vm0, %v768_v25 }
  0xfb   : > { %v651_v29 = vpop.permute.xlu1 %650  ;;  %v646_v30 = vpop.permute.xlu0 %645  ;;  %2276 = vmatprep.mubr.msk.f32.mxu0 %vm802_vm0, %v769_v26 }
  0xfc   : > { %v771_v32 = vmul.f32 %v646_v30, %v323_v28  ;;  %v772_v37 = vmul.f32 %v651_v29, %v324_v33 }
  0xfe   : > { %2277 = vmatmul.mubr.msk.f32.gmra.mrb[46].mxu0 %vm802_vm0, %v770_v31 }
  0xff   : > { %v661_v35 = vpop.permute.xlu1 %660  ;;  %v656_v36 = vpop.permute.xlu0 %655  ;;  %2279 = vmatprep.mubr.msk.f32.mxu0 %vm802_vm0, %v771_v32 }
 0x100   : > { %v773_v38 = vmul.f32 %v656_v36, %v325_v34  ;;  %v774_v43 = vmul.f32 %v661_v35, %v326_v39 }
 0x102   : > { %2280 = vmatmul.mubr.msk.f32.gmra.mrb[48].mxu0 %vm802_vm0, %v772_v37 }
 0x103   : > { %v671_v41 = vpop.permute.xlu1 %670  ;;  %v666_v42 = vpop.permute.xlu0 %665  ;;  %2282 = vmatprep.mubr.msk.f32.mxu0 %vm802_vm0, %v773_v38 }
 0x104   : > { %v775_v44 = vmul.f32 %v666_v42, %v327_v40  ;;  %v776_v49 = vmul.f32 %v671_v41, %v328_v45 }
 0x106   : > { %2283 = vmatmul.mubr.msk.f32.gmra.mrb[50].mxu0 %vm802_vm0, %v774_v43 }
 0x107   : > { %v681_v47 = vpop.permute.xlu1 %680  ;;  %v676_v48 = vpop.permute.xlu0 %675  ;;  %2285 = vmatprep.mubr.msk.f32.mxu0 %vm802_vm0, %v775_v44 }
 0x108   : > { %v777_v50 = vmul.f32 %v676_v48, %v329_v46  ;;  %v778_v55 = vmul.f32 %v681_v47, %v330_v51 }
 0x10a   : > { %2286 = vmatmul.mubr.msk.f32.gmra.mrb[52].mxu0 %vm802_vm0, %v776_v49 }
 0x10b   : > { %v691_v53 = vpop.permute.xlu1 %690  ;;  %v686_v54 = vpop.permute.xlu0 %685  ;;  %2288 = vmatprep.mubr.msk.f32.mxu0 %vm802_vm0, %v777_v50 }
 0x10c   : > { %v779_v56 = vmul.f32 %v686_v54, %v331_v52  ;;  %v780_v61 = vmul.f32 %v691_v53, %v332_v57 }
 0x10e   : > { %2289 = vmatmul.mubr.msk.f32.gmra.mrb[54].mxu0 %vm802_vm0, %v778_v55 }
 0x10f   : > { %v701_v59 = vpop.permute.xlu1 %700  ;;  %v696_v60 = vpop.permute.xlu0 %695  ;;  %2291 = vmatprep.mubr.msk.f32.mxu0 %vm802_vm0, %v779_v56 }
 0x110   : > { %v781_v62 = vmul.f32 %v696_v60, %v333_v58  ;;  %v782_v3 = vmul.f32 %v701_v59, %v334_v63 }
 0x112   : > { %2292 = vmatmul.mubr.msk.f32.gmra.mrb[56].mxu0 %vm802_vm0, %v780_v61 }
 0x113   : > { %v711_v1 = vpop.permute.xlu1 %710  ;;  %v706_v2 = vpop.permute.xlu0 %705  ;;  %2294 = vmatprep.mubr.msk.f32.mxu0 %vm802_vm0, %v781_v62 }
 0x114   : > { %v783_v4 = vmul.f32 %v706_v2, %v335_v0  ;;  %v784_v8 = vmul.f32 %v711_v1, %v336_v5 }
 0x116   : > { %2295 = vmatmul.mubr.msk.f32.gmra.mrb[58].mxu0 %vm802_vm0, %v782_v3 }
 0x117   : > { %v716_v7 = vpop.permute.xlu0 %715  ;;  %2297 = vmatprep.mubr.msk.f32.mxu0 %vm802_vm0, %v783_v4  ;;  %v721_v10 = vpop.permute.xlu1 %720 }
 0x118   : > { %v785_v9 = vmul.f32 %v716_v7, %v337_v6  ;;  %v786_v12 = vmul.f32 %v721_v10, %v338_v11 }
 0x11a   : > { %2298 = vmatmul.mubr.msk.f32.gmra.mrb[60].mxu0 %vm802_vm0, %v784_v8 }
 0x11b   : > { %2300 = vmatprep.mubr.msk.f32.mxu0 %vm802_vm0, %v785_v9 }
 0x11e   : > { %2301 = vmatmul.mubr.msk.f32.gmra.mrb[62].mxu0 %vm802_vm0, %v786_v12 }
 0x175   : > { %v2209_v15 = vpop.f32.mrb[0].mxu0 }
 0x176   : > { %v1067_v16 = vadd.f32 %v2209_v15, %v2855_v14  ;;  %v1061_v17 = vpop.f32.mrb[1].mxu0 }
 0x177   : > { %v1062_v18 = vadd.f32 %v2855_v14, %v1061_v17 }
 0x178   : > { %v1381_v19 = vmax.f32 %v1067_v16, 0.0 }
 0x179   : > { %v1380_v20 = vmax.f32 %v1062_v18, 0.0  ;;  %v2212_v21 = vpop.f32.mrb[2].mxu0 }
 0x17a   : > { %v1077_v22 = vadd.f32 %v2212_v21, %v2855_v14  ;;  %v1071_v23 = vpop.f32.mrb[3].mxu0 }
 0x17b   : > { %v2860_v24 = vpack.c.bf16 %v1381_v19, %v1380_v20  ;;  %v1072_v25 = vadd.f32 %v2855_v14, %v1071_v23 }
 0x17c   : > { %v1383_v26 = vmax.f32 %v1077_v22, 0.0 }
 0x17d   : > { %v1382_v27 = vmax.f32 %v1072_v25, 0.0  ;;  %v2215_v28 = vpop.f32.mrb[4].mxu0 }
 0x17e   : > { %v1087_v29 = vadd.f32 %v2215_v28, %v2855_v14  ;;  %v1081_v30 = vpop.f32.mrb[5].mxu0 }
 0x17f   : > { %v2864_v31 = vpack.c.bf16 %v1383_v26, %v1382_v27  ;;  %v1082_v32 = vadd.f32 %v2855_v14, %v1081_v30 }
 0x180   : > { %v1385_v33 = vmax.f32 %v1087_v29, 0.0 }
 0x181   : > { %v1384_v34 = vmax.f32 %v1082_v32, 0.0  ;;  %v2218_v35 = vpop.f32.mrb[6].mxu0 }
 0x182   : > { %v1097_v36 = vadd.f32 %v2218_v35, %v2855_v14  ;;  %v1091_v37 = vpop.f32.mrb[7].mxu0 }
 0x183   : > { %v2868_v38 = vpack.c.bf16 %v1385_v33, %v1384_v34  ;;  %v1092_v39 = vadd.f32 %v2855_v14, %v1091_v37 }
 0x184   : > { %v1387_v40 = vmax.f32 %v1097_v36, 0.0 }
 0x185   : > { %v1386_v41 = vmax.f32 %v1092_v39, 0.0  ;;  %v2221_v42 = vpop.f32.mrb[8].mxu0 }
 0x186   : > { %v1107_v43 = vadd.f32 %v2221_v42, %v2855_v14  ;;  %v1101_v44 = vpop.f32.mrb[9].mxu0 }
 0x187   : > { %v2872_v45 = vpack.c.bf16 %v1387_v40, %v1386_v41  ;;  %v1102_v46 = vadd.f32 %v2855_v14, %v1101_v44 }
 0x188   : > { %v1389_v47 = vmax.f32 %v1107_v43, 0.0 }
 0x189   : > { %v1388_v48 = vmax.f32 %v1102_v46, 0.0  ;;  %v2224_v49 = vpop.f32.mrb[10].mxu0 }
 0x18a   : > { %v1117_v50 = vadd.f32 %v2224_v49, %v2855_v14  ;;  %v1111_v51 = vpop.f32.mrb[11].mxu0 }
 0x18b   : > { %v2876_v52 = vpack.c.bf16 %v1389_v47, %v1388_v48  ;;  %v1112_v53 = vadd.f32 %v2855_v14, %v1111_v51 }
 0x18c   : > { %v1391_v54 = vmax.f32 %v1117_v50, 0.0 }
 0x18d   : > { %v1390_v55 = vmax.f32 %v1112_v53, 0.0  ;;  %v2227_v56 = vpop.f32.mrb[12].mxu0 }
 0x18e   : > { %v1127_v57 = vadd.f32 %v2227_v56, %v2855_v14  ;;  %v1121_v58 = vpop.f32.mrb[13].mxu0 }
 0x18f   : > { %v2880_v59 = vpack.c.bf16 %v1391_v54, %v1390_v55  ;;  %v1122_v60 = vadd.f32 %v2855_v14, %v1121_v58 }
 0x190   : > { %v1393_v61 = vmax.f32 %v1127_v57, 0.0 }
 0x191   : > { %v1392_v62 = vmax.f32 %v1122_v60, 0.0  ;;  %v2230_v63 = vpop.f32.mrb[14].mxu0 }
 0x192   : > { %v1137_v0 = vadd.f32 %v2230_v63, %v2855_v14  ;;  %v1131_v1 = vpop.f32.mrb[15].mxu0 }
 0x193   : > { %v2884_v2 = vpack.c.bf16 %v1393_v61, %v1392_v62  ;;  %v1132_v3 = vadd.f32 %v2855_v14, %v1131_v1 }
 0x194   : > { %v1395_v4 = vmax.f32 %v1137_v0, 0.0 }
 0x195   : > { %v1394_v5 = vmax.f32 %v1132_v3, 0.0  ;;  %v2233_v6 = vpop.f32.mrb[16].mxu0 }
 0x196   : > { %v1147_v7 = vadd.f32 %v2233_v6, %v2855_v14  ;;  %v1141_v8 = vpop.f32.mrb[17].mxu0 }
 0x197   : > { %v2888_v9 = vpack.c.bf16 %v1395_v4, %v1394_v5  ;;  %v1142_v10 = vadd.f32 %v2855_v14, %v1141_v8 }
 0x198   : > { %v1397_v11 = vmax.f32 %v1147_v7, 0.0 }
 0x199   : > { %v1396_v12 = vmax.f32 %v1142_v10, 0.0  ;;  %v2236_v15 = vpop.f32.mrb[18].mxu0 }
 0x19a   : > { %v1157_v16 = vadd.f32 %v2236_v15, %v2855_v14  ;;  %v1151_v17 = vpop.f32.mrb[19].mxu0 }
 0x19b   : > { %v1152_v19 = vadd.f32 %v2855_v14, %v1151_v17  ;;  %v2319_v20 = vpack.c.bf16 %v1397_v11, %v1396_v12 }
 0x19c   : > { %v1399_v21 = vmax.f32 %v1157_v16, 0.0 }
 0x19d   : > { %v1398_v22 = vmax.f32 %v1152_v19, 0.0  ;;  %v2239_v23 = vpop.f32.mrb[20].mxu0  ;;  %2321 = vmatprep.subr.msk.bf16.mxu1 %vm2894_vm2, %v2319_v20 }
 0x19e   : > { %v1167_v25 = vadd.f32 %v2239_v23, %v2855_v14  ;;  %v1161_v26 = vpop.f32.mrb[21].mxu0  ;;  %2324 = vmatpush3.bf16.xpose.msk.msra.mxu1 %vm2894_vm2, %v2860_v24 }
 0x19f   : > { %v2325_v27 = vpack.c.bf16 %v1399_v21, %v1398_v22  ;;  %v1162_v28 = vadd.f32 %v2855_v14, %v1161_v26 }
 0x1a0   : > { %v1401_v29 = vmax.f32 %v1167_v25, 0.0 }
 0x1a1   : > { %v1400_v30 = vmax.f32 %v1162_v28, 0.0  ;;  %v2242_v32 = vpop.f32.mrb[22].mxu0  ;;  %2327 = vmatprep.subr.msk.bf16.mxu1 %vm2894_vm2, %v2325_v27 }
 0x1a2   : > { %v1177_v33 = vadd.f32 %v2242_v32, %v2855_v14  ;;  %v1171_v34 = vpop.f32.mrb[23].mxu0 }
 0x1a3   : > { %v2331_v35 = vpack.c.bf16 %v1401_v29, %v1400_v30  ;;  %v1172_v36 = vadd.f32 %v2855_v14, %v1171_v34 }
 0x1a4   : > { %v1403_v37 = vmax.f32 %v1177_v33, 0.0 }
 0x1a5   : > { %v1402_v39 = vmax.f32 %v1172_v36, 0.0  ;;  %v2245_v40 = vpop.f32.mrb[24].mxu0 }
 0x1a6   : > { %v1187_v24 = vadd.f32 %v2245_v40, %v2855_v14  ;;  %v1181_v41 = vpop.f32.mrb[25].mxu0  ;;  %2330 = vmatpush3.bf16.xpose.msk.msra.mxu1 %vm2894_vm2, %v2864_v31 }
 0x1a7   : > { %v2337_v42 = vpack.c.bf16 %v1403_v37, %v1402_v39  ;;  %v1182_v43 = vadd.f32 %v2855_v14, %v1181_v41  ;;  %2333 = vmatprep.subr.msk.bf16.mxu1 %vm2894_vm2, %v2331_v35 }
 0x1a8   : > { %v1405_v44 = vmax.f32 %v1187_v24, 0.0 }
 0x1a9   : > { %v1404_v46 = vmax.f32 %v1182_v43, 0.0  ;;  %v2248_v47 = vpop.f32.mrb[26].mxu0 }
 0x1aa   : > { %v1197_v48 = vadd.f32 %v2248_v47, %v2855_v14  ;;  %v1191_v49 = vpop.f32.mrb[27].mxu0 }
 0x1ab   : > { %v2343_v50 = vpack.c.bf16 %v1405_v44, %v1404_v46  ;;  %v1192_v51 = vadd.f32 %v2855_v14, %v1191_v49 }
 0x1ac   : > { %v1407_v53 = vmax.f32 %v1197_v48, 0.0 }
 0x1ad   : > { %v1406_v54 = vmax.f32 %v1192_v51, 0.0  ;;  %v2251_v55 = vpop.f32.mrb[28].mxu0 }
 0x1ae   : > { %v1207_v31 = vadd.f32 %v2251_v55, %v2855_v14  ;;  %v1201_v56 = vpop.f32.mrb[29].mxu0  ;;  %2336 = vmatpush3.bf16.xpose.msk.msra.mxu1 %vm2894_vm2, %v2868_v38 }
 0x1af   : > { %v2349_v57 = vpack.c.bf16 %v1407_v53, %v1406_v54  ;;  %v1202_v58 = vadd.f32 %v2855_v14, %v1201_v56  ;;  %2339 = vmatprep.subr.msk.bf16.mxu1 %vm2894_vm2, %v2337_v42 }
 0x1b0   : > { %v1409_v60 = vmax.f32 %v1207_v31, 0.0 }
 0x1b1   : > { %v1408_v61 = vmax.f32 %v1202_v58, 0.0  ;;  %v2254_v62 = vpop.f32.mrb[30].mxu0 }
 0x1b2   : > { %v1217_v63 = vadd.f32 %v2254_v62, %v2855_v14  ;;  %v1211_v0 = vpop.f32.mrb[31].mxu0 }
 0x1b3   : > { %v2355_v1 = vpack.c.bf16 %v1409_v60, %v1408_v61  ;;  %v1212_v3 = vadd.f32 %v2855_v14, %v1211_v0 }
 0x1b4   : > { %v1411_v4 = vmax.f32 %v1217_v63, 0.0 }
 0x1b5   : > { %v1410_v5 = vmax.f32 %v1212_v3, 0.0  ;;  %v2257_v6 = vpop.f32.mrb[32].mxu0 }
 0x1b6   : > { %v1227_v38 = vadd.f32 %v2257_v6, %v2855_v14  ;;  %v1221_v7 = vpop.f32.mrb[33].mxu0  ;;  %2342 = vmatpush3.bf16.xpose.msk.msra.mxu1 %vm2894_vm2, %v2872_v45 }
 0x1b7   : > { %v2361_v8 = vpack.c.bf16 %v1411_v4, %v1410_v5  ;;  %v1222_v10 = vadd.f32 %v2855_v14, %v1221_v7  ;;  %2345 = vmatprep.subr.msk.bf16.mxu1 %vm2894_vm2, %v2343_v50 }
 0x1b8   : > { %v1413_v11 = vmax.f32 %v1227_v38, 0.0 }
 0x1b9   : > { %v1412_v12 = vmax.f32 %v1222_v10, 0.0  ;;  %v2260_v15 = vpop.f32.mrb[34].mxu0 }
 0x1ba   : > { %v1237_v16 = vadd.f32 %v2260_v15, %v2855_v14  ;;  %v1231_v17 = vpop.f32.mrb[35].mxu0 }
 0x1bb   : > { %v2936_v19 = vpack.c.bf16 %v1413_v11, %v1412_v12  ;;  %v1232_v20 = vadd.f32 %v2855_v14, %v1231_v17 }
 0x1bc   : > { %v1415_v21 = vmax.f32 %v1237_v16, 0.0 }
 0x1bd   : > { %v1414_v22 = vmax.f32 %v1232_v20, 0.0  ;;  %v2263_v23 = vpop.f32.mrb[36].mxu0 }
 0x1be   : > { %v1247_v45 = vadd.f32 %v2263_v23, %v2855_v14  ;;  %v1241_v25 = vpop.f32.mrb[37].mxu0  ;;  %2348 = vmatpush3.bf16.xpose.msk.msra.mxu1 %vm2894_vm2, %v2876_v52 }
 0x1bf   : > { %v2943_v26 = vpack.c.bf16 %v1415_v21, %v1414_v22  ;;  %v1242_v27 = vadd.f32 %v2855_v14, %v1241_v25  ;;  %2351 = vmatprep.subr.msk.bf16.mxu1 %vm2894_vm2, %v2349_v57 }
 0x1c0   : > { %v1417_v28 = vmax.f32 %v1247_v45, 0.0 }
 0x1c1   : > { %v1416_v29 = vmax.f32 %v1242_v27, 0.0  ;;  %v2266_v30 = vpop.f32.mrb[38].mxu0 }
 0x1c2   : > { %v1257_v32 = vadd.f32 %v2266_v30, %v2855_v14  ;;  %v1251_v33 = vpop.f32.mrb[39].mxu0 }
 0x1c3   : > { %v2949_v34 = vpack.c.bf16 %v1417_v28, %v1416_v29  ;;  %v1252_v35 = vadd.f32 %v2855_v14, %v1251_v33 }
 0x1c4   : > { %v1419_v36 = vmax.f32 %v1257_v32, 0.0 }
 0x1c5   : > { %v1418_v37 = vmax.f32 %v1252_v35, 0.0  ;;  %v2269_v52 = vpop.f32.mrb[40].mxu0 }
 0x1c6   : > { %v1267_v39 = vadd.f32 %v2269_v52, %v2855_v14  ;;  %v1261_v40 = vpop.f32.mrb[41].mxu0  ;;  %2354 = vmatpush3.bf16.xpose.msk.msra.mxu1 %vm2894_vm2, %v2880_v59 }
 0x1c7   : > { %v2956_v24 = vpack.c.bf16 %v1419_v36, %v1418_v37  ;;  %v1262_v41 = vadd.f32 %v2855_v14, %v1261_v40  ;;  %2357 = vmatprep.subr.msk.bf16.mxu1 %vm2894_vm2, %v2355_v1 }
 0x1c8   : > { %v1421_v42 = vmax.f32 %v1267_v39, 0.0 }
 0x1c9   : > { %v1420_v43 = vmax.f32 %v1262_v41, 0.0  ;;  %v2272_v44 = vpop.f32.mrb[42].mxu0 }
 0x1ca   : > { %v1277_v46 = vadd.f32 %v2272_v44, %v2855_v14  ;;  %v1271_v47 = vpop.f32.mrb[43].mxu0 }
 0x1cb   : > { %v2962_v48 = vpack.c.bf16 %v1421_v42, %v1420_v43  ;;  %v1272_v49 = vadd.f32 %v2855_v14, %v1271_v47 }
 0x1cc   : > { %v1423_v50 = vmax.f32 %v1277_v46, 0.0 }
 0x1cd   : > { %v1422_v51 = vmax.f32 %v1272_v49, 0.0  ;;  %v2275_v59 = vpop.f32.mrb[44].mxu0 }
 0x1ce   : > { %v1287_v53 = vadd.f32 %v2275_v59, %v2855_v14  ;;  %v1281_v54 = vpop.f32.mrb[45].mxu0  ;;  %2360 = vmatpush3.bf16.xpose.msk.msra.mxu1 %vm2894_vm2, %v2884_v2 }
 0x1cf   : > { %v2969_v55 = vpack.c.bf16 %v1423_v50, %v1422_v51  ;;  %v1282_v31 = vadd.f32 %v2855_v14, %v1281_v54  ;;  %2363 = vmatprep.subr.msk.bf16.mxu1 %vm2894_vm2, %v2361_v8 }
 0x1d0   : > { %v1425_v56 = vmax.f32 %v1287_v53, 0.0 }
 0x1d1   : > { %v1424_v57 = vmax.f32 %v1282_v31, 0.0  ;;  %v2278_v58 = vpop.f32.mrb[46].mxu0 }
 0x1d2   : > { %v1297_v60 = vadd.f32 %v2278_v58, %v2855_v14  ;;  %v1291_v61 = vpop.f32.mrb[47].mxu0 }
 0x1d3   : > { %v2975_v62 = vpack.c.bf16 %v1425_v56, %v1424_v57  ;;  %v1292_v63 = vadd.f32 %v2855_v14, %v1291_v61 }
 0x1d4   : > { %v1427_v0 = vmax.f32 %v1297_v60, 0.0 }
 0x1d5   : > { %v1426_v1 = vmax.f32 %v1292_v63, 0.0  ;;  %v2281_v2 = vpop.f32.mrb[48].mxu0 }
 0x1d6   : > { %v1307_v3 = vadd.f32 %v2281_v2, %v2855_v14  ;;  %v1301_v4 = vpop.f32.mrb[49].mxu0  ;;  %2366 = vmatpush3.bf16.xpose.msk.msra.mxu1 %vm2894_vm2, %v2888_v9 }
 0x1d7   : > { %v2982_v5 = vpack.c.bf16 %v1427_v0, %v1426_v1  ;;  %v1302_v6 = vadd.f32 %v2855_v14, %v1301_v4  ;;  %v2523_v4 = vmov 1966171168  }
 0x1d8   : > { %v1429_v38 = vmax.f32 %v1307_v3, 0.0 }
 0x1d9   : > { %v1428_v7 = vmax.f32 %v1302_v6, 0.0  ;;  %v2284_v8 = vpop.f32.mrb[50].mxu0  ;;  %v1794_v6 = vlaneseq }
 0x1da   : > { %v1317_v10 = vadd.f32 %v2284_v8, %v2855_v14  ;;  %v1311_v11 = vpop.f32.mrb[51].mxu0 }
 0x1db   : > { %v2367_v12 = vpack.c.bf16 %v1429_v38, %v1428_v7  ;;  %v1312_v15 = vadd.f32 %v2855_v14, %v1311_v11  ;;  %v1795_v7 = vshrl.u32 %v1794_v6, 7  ;;  %vm1816_vm3 = vcmp.lt.s32.totalorder %v1794_v6, 512 }
 0x1dc   : > { %v1431_v16 = vmax.f32 %v1317_v10, 0.0 }
 0x1dd   : > { %v1430_v17 = vmax.f32 %v1312_v15, 0.0  ;;  %v2287_v20 = vpop.f32.mrb[52].mxu0  ;;  %2156 = vmatmul.mubr.msk.f32.vlgmr.msra.gmra.mrb[0].mxu1 %vm1447_vm1, %v2848_v13  ;;  %2369 = vmatprep.subr.msk.bf16.mxu1 %vm2894_vm2, %v2367_v12 }
 0x1de   : > { %v1327_v9 = vadd.f32 %v2287_v20, %v2855_v14  ;;  %v1321_v21 = vpop.f32.mrb[53].mxu0  ;;  %2372 = vmatpush3.bf16.xpose.msk.msra.mxu1 %vm2894_vm2, %v2936_v19  ;;  %2189 = vmatprep.mubr.msk.f32.mxu1 %vm1447_vm1, %v2848_v13 }
 0x1df   : > { %v2373_v22 = vpack.c.bf16 %v1431_v16, %v1430_v17  ;;  %v1322_v23 = vadd.f32 %v2855_v14, %v1321_v21 }
 0x1e0   : > { %v1433_v45 = vmax.f32 %v1327_v9, 0.0 }
 0x1e1   : > { %v1432_v25 = vmax.f32 %v1322_v23, 0.0  ;;  %v2290_v27 = vpop.f32.mrb[54].mxu0  ;;  %2375 = vmatprep.subr.msk.bf16.mxu1 %vm2894_vm2, %v2373_v22 }
 0x1e2   : > { %v1337_v28 = vadd.f32 %v2290_v27, %v2855_v14  ;;  %v1331_v29 = vpop.f32.mrb[55].mxu0 }
 0x1e3   : > { %v2379_v30 = vpack.c.bf16 %v1433_v45, %v1432_v25  ;;  %v1332_v32 = vadd.f32 %v2855_v14, %v1331_v29 }
 0x1e4   : > { %v1435_v33 = vmax.f32 %v1337_v28, 0.0 }
 0x1e5   : > { %v1434_v19 = vmax.f32 %v1332_v32, 0.0  ;;  %v2293_v35 = vpop.f32.mrb[56].mxu0 }
 0x1e6   : > { %v1347_v36 = vadd.f32 %v2293_v35, %v2855_v14  ;;  %v1341_v37 = vpop.f32.mrb[57].mxu0  ;;  %2378 = vmatpush3.bf16.xpose.msk.msra.mxu1 %vm2894_vm2, %v2943_v26 }
 0x1e7   : > { %v2385_v52 = vpack.c.bf16 %v1435_v33, %v1434_v19  ;;  %v1342_v39 = vadd.f32 %v2855_v14, %v1341_v37  ;;  %2381 = vmatprep.subr.msk.bf16.mxu1 %vm2894_vm2, %v2379_v30 }
 0x1e8   : > { %v1437_v40 = vmax.f32 %v1347_v36, 0.0 }
 0x1e9   : > { %v1436_v41 = vmax.f32 %v1342_v39, 0.0  ;;  %v2296_v42 = vpop.f32.mrb[58].mxu0 }
 0x1ea   : > { %v1357_v43 = vadd.f32 %v2296_v42, %v2855_v14  ;;  %v1351_v44 = vpop.f32.mrb[59].mxu0 }
 0x1eb   : > { %v2391_v46 = vpack.c.bf16 %v1437_v40, %v1436_v41  ;;  %v1352_v47 = vadd.f32 %v2855_v14, %v1351_v44 }
 0x1ec   : > { %v1439_v49 = vmax.f32 %v1357_v43, 0.0 }
 0x1ed   : > { %v1438_v50 = vmax.f32 %v1352_v47, 0.0  ;;  %v2299_v51 = vpop.f32.mrb[60].mxu0 }
 0x1ee   : > { %v1367_v26 = vadd.f32 %v2299_v51, %v2855_v14  ;;  %v1361_v59 = vpop.f32.mrb[61].mxu0  ;;  %2384 = vmatpush3.bf16.xpose.msk.msra.mxu1 %vm2894_vm2, %v2949_v34 }
 0x1ef   : > { %v2397_v53 = vpack.c.bf16 %v1439_v49, %v1438_v50  ;;  %v1362_v54 = vadd.f32 %v2855_v14, %v1361_v59  ;;  %2387 = vmatprep.subr.msk.bf16.mxu1 %vm2894_vm2, %v2385_v52 }
 0x1f0   : > { %v1441_v31 = vmax.f32 %v1367_v26, 0.0 }
 0x1f1   : > { %v1440_v56 = vmax.f32 %v1362_v54, 0.0  ;;  %v2302_v57 = vpop.f32.mrb[62].mxu0 }
 0x1f2   : > { %v1377_v58 = vadd.f32 %v2302_v57, %v2855_v14  ;;  %v1371_v60 = vpop.f32.mrb[63].mxu0 }
 0x1f3   : > { %v2403_v61 = vpack.c.bf16 %v1441_v31, %v1440_v56  ;;  %v1372_v63 = vadd.f32 %v2855_v14, %v1371_v60  ;;  %v1446_v14 = vstv %s1445_s5 }
 0x1f4   : > { %v1443_v0 = vmax.f32 %v1377_v58, 0.0 }
 0x1f5   : > { %v1442_v1 = vmax.f32 %v1372_v63, 0.0 }
 0x1f6   : > { %2390 = vmatpush3.bf16.xpose.msk.msra.mxu1 %vm2894_vm2, %v2956_v24 }
 0x1f7   : > { %v2409_v34 = vpack.c.bf16 %v1443_v0, %v1442_v1  ;;  %2393 = vmatprep.subr.msk.bf16.mxu1 %vm2894_vm2, %v2391_v46 }
 0x1fe   : > { %2396 = vmatpush3.bf16.xpose.msk.msra.mxu1 %vm2894_vm2, %v2962_v48 }
 0x1ff   : > { %2399 = vmatprep.subr.msk.bf16.mxu1 %vm2894_vm2, %v2397_v53 }
 0x206   : > { %2402 = vmatpush3.bf16.xpose.msk.msra.mxu1 %vm2894_vm2, %v2969_v55 }
 0x207   : > { %2405 = vmatprep.subr.msk.bf16.mxu1 %vm2894_vm2, %v2403_v61 }
 0x20e   : > { %2408 = vmatpush3.bf16.xpose.msk.msra.mxu1 %vm2894_vm2, %v2975_v62  ;;  %v1792_v62 = vunpack.c.l.s4 %v2523_v4 }
 0x20f   : > { %2411 = vmatprep.subr.msk.bf16.mxu1 %vm2894_vm2, %v2409_v34 }
 0x210   : > { %v1793_v38 = vunpack.c.0.s8 %v1792_v62 }
 0x212   : > { %v1796_v10 = vsub.s32 %v1793_v38, %v1795_v7 }
 0x216   : > { %2414 = vmatpush3.bf16.xpose.msk.msra.mxu1 %vm2894_vm2, %v2982_v5 }
 0x21d   : > { %2190 = vmatmul.mubr.msk.f32.vlgmr.msra.gmra.mrb[2].mxu1 %vm1447_vm1, %v2848_v13 }
 0x2b0   : > { %v1709_v24 = vpop.f32.mrb[0].mxu1 }
 0x2b1   : > { %v1710_v48 = vadd.f32 %v1709_v24, %v1446_v14  ;;  %v1711_v55 = vpop.f32.mrb[1].mxu1 }
 0x2b2   : > { %v1712_v2 = vadd.f32 %v1711_v55, %v1446_v14 }
 0x2b4   : > { %v1789_v3 = vcombine.low %v1710_v48, %v1712_v2 }
 0x2b6   : > { %v1797_v12 = vrot.slane %v1789_v3, %v1796_v10 }
 0x2f0   : > { %v1780_v8 = vpop.f32.mrb[2].mxu1 }
 0x2f1   : > { %v1781_v18 = vadd.f32 %v1780_v8, %v1446_v14  ;;  %v1782_v5 = vpop.f32.mrb[3].mxu1 }
 0x2f2   : > { %v1783_v13 = vadd.f32 %v1782_v5, %v1446_v14 }
 0x2f4   : > { %v1790_v11 = vcombine.low %v1781_v18, %v1783_v13 }
 0x2f6   : > { %v1804_v15 = vrot.slane %v1790_v11, %v1796_v10 }
 0x2f8   : > { %v1805_v16 = vcombine.low %v1797_v12, %v1804_v15 }
 0x2fa   : > { %v1812_v17 = vrot.slane %v1805_v16, %v1796_v10 }
 0x2fc   : > { %1818 = vst.msk [vmem:[%s262_s30] sm:$0xf] %vm1816_vm3, %v1812_v17 }
 0x2fd   : > { %2471 = shalt.err (!%p2468_p3)
}
 0x2fe   : > { %s2472_s10 = scalar_lea.hbm %s3050_s14, 64  ;;  %s2476_s22 = scalar_lea.hbm %s3098_s6, 256 }
 0x2ff   : > { %p2473_p4 = scmp.ne.s32.totalorder %s3050_s14, %s2472_s10  ;;  %p2477_p9 = scmp.lt.u32.totalorder %s3050_s14, %s3098_s6 }
 0x300   : > { %p2478_p10 = scmp.lt.u32.totalorder %s2476_s22, %s2472_s10  ;;  %p2480_p12 = scmp.lt.u32.totalorder %s2472_s10, %s3050_s14 }
 0x301   : > { %p2474_p7 = pnand %p2473_p4, %p2598_p5 }
 0x302   : > { %p2479_p11 = por %p2478_p10, %p2477_p9 }
 0x303   : > { %p2475_p8 = pneg %p2474_p7 }
 0x304   : > { %p2481_p13 = por %p2480_p12, %p2479_p11 }
 0x306   : > { %p2482_p0 = pnand %p2481_p13, %p2475_p8 }
 0x308   : > { %2485 = shalt.err (!%p2482_p0)
}
 0x309   : > { %2415 = dma.vmem_to_hbm [thread:$0]  (%p2598_p5), %s3052_s11, 64, %s3050_s14, %s1820_s15  }
 0x30a PF: > { %p2421_p1 = scmp.ge.s32.totalorder %s2520_s26, 2  ;;  %s1846_s29 = sand.u32 1, %s2508_s23  }
 0x30b   : > { %s1847_s30 = scalar_lea.sflag [#allocation4], %s1846_s29 }
 0x30c   : > { %p2418_p2 = pnand %p2421_p1, %p2602_p6 }
 0x30e   : > { %2503 = dma.done.wait (!%p2418_p2), %s1847_s30, 64  }
 0x30f   : > { %2505 = vsyncadd (!%p2418_p2), %s1847_s30, 4294967232  ;;  %p17_p3 = scmp.ge.s32.totalorder %s2586_s28, 6   ;;  %s3103_s23 = smov %s2512_s24 }
 0x310   : > { %s3104_s24 = smov %s2516_s25  ;;  %s3105_s25 = smov %s2596_s7 }
 0x311   : > { %s3106_s26 = smov %s2586_s28  ;;  %19 = sbr.rel (!%p17_p3) target bundleno = 5 (0x5), region = 82 }
 0x318   :  { %1852 = vsyncpa [#allocation4], 1 }
 0x319   :  { %1854 = vsyncpa [#allocation4 + $0x1], 1 }

</bundles_post_ra>
